<compile_context>
chip_gen: v5e
topology: v5e:2x2
jax: 0.10.0
libtpu: 0.0.40
codegen_flags: <defaults>
</compile_context>

<pallas_src>
import functools
import math

import jax
import jax.numpy as jnp
from jax.experimental import pallas as pl
from jax.experimental.pallas import tpu as pltpu


# ---------------------------------------------------------------------------
# Stage A: per-head attention (projections + softmax + attn @ V).
# Grid = (batch, head, query-tile); qi is innermost ("arbitrary").
# ---------------------------------------------------------------------------
def _attn_kernel(q_ref, k_ref, v_ref,
                 wq_ref, bq_ref, wk_ref, bk_ref, wv_ref, bv_ref,
                 *rest, scale, matmul_dtype, with_attn):
    if with_attn:
        ctx_ref, attn_ref, kh_scr, vh_scr = rest
    else:
        ctx_ref, kh_scr, vh_scr = rest
        attn_ref = None

    qi = pl.program_id(2)
    mdt = matmul_dtype
    inv_scale = 1.0 / scale
    # Contract the last axis of both operands: x @ W^T with no explicit .T.
    contract_last = (((1,), (1,)), ((), ()))

    # K/V projection for this (batch, head): done once, reused by all q tiles.
    @pl.when(qi == 0)
    def _project_kv():
        kh = jax.lax.dot_general(k_ref[0], wk_ref[0], contract_last,
                                 preferred_element_type=jnp.float32) + bk_ref[0]
        vh = jax.lax.dot_general(v_ref[0], wv_ref[0], contract_last,
                                 preferred_element_type=jnp.float32) + bv_ref[0]
        kh_scr[...] = kh.astype(kh_scr.dtype)
        vh_scr[...] = vh.astype(vh_scr.dtype)

    # Q projection for this query tile; fold 1/scale into Q (bias included).
    qh = (jax.lax.dot_general(q_ref[0], wq_ref[0], contract_last,
                              preferred_element_type=jnp.float32)
          + bq_ref[0]) * inv_scale                                   # (TQ, D) f32

    # energy = (Q/scale) @ K^T, contraction over D, KV axis on lanes.
    energy = jax.lax.dot_general(qh.astype(mdt), kh_scr[...], contract_last,
                                 preferred_element_type=jnp.float32)  # (TQ, L)

    # Numerically-stable softmax in f32 with an exact reciprocal so the stored
    # attention rows sum to 1 (review correctness concern).
    m = jnp.max(energy, axis=-1, keepdims=True)
    p = jnp.exp(energy - m)
    inv_denom = 1.0 / jnp.sum(p, axis=-1, keepdims=True)
    attn = p * inv_denom

    if with_attn:
        attn_ref[0, 0] = attn.astype(attn_ref.dtype)

    # TODO(synk): training-mode dropout on the attention weights not implemented.

    ctx = jnp.dot(attn.astype(mdt), vh_scr[...],
                  preferred_element_type=jnp.float32)                # (TQ, D)
    ctx_ref[0, 0] = ctx.astype(ctx_ref.dtype)


# ---------------------------------------------------------------------------
# Stage B: output projection, one deep-K (K = E) GEMM per row tile.
# ---------------------------------------------------------------------------
def _out_proj_kernel(x_ref, wf_ref, bf_ref, out_ref):
    y = jax.lax.dot_general(x_ref[0], wf_ref[...], (((1,), (1,)), ((), ())),
                            preferred_element_type=jnp.float32)      # (TL, E)
    out_ref[0] = (y + bf_ref[...]).astype(out_ref.dtype)


def _pick_query_tile(L, max_q_tile):
    """Full sequence when small; else a fixed multiple-of-8 row tile + padding."""
    if L <= max_q_tile:
        tq = L
    else:
        tq = max(8, (max_q_tile // 8) * 8)
    lp = ((L + tq - 1) // tq) * tq
    return tq, lp, lp // tq


def multi_head_att(query, key, value, params, head_num, scale=None,
                   matmul_dtype=jnp.bfloat16, max_q_tile=256,
                   with_attn=True, attn_dtype=None):
    """Pallas implementation of MultiHeadAtt.forward (eval mode).

    query/key/value: (B, L, E) float32.
    params: dict with W_Q, b_Q, W_K, b_K, W_V, b_V, W_fc, b_fc
            (weights stored PyTorch-style as (E_out, E_in)).
    Returns (x, attention): (B, L, E) and (B, H, L, L)  (attention is None when
    with_attn=False).
    """
    B, L, E = query.shape
    H = head_num
    assert E % H == 0
    D = E // H
    scale_val = float(scale) if scale is not None else math.sqrt(D)
    mdt = matmul_dtype
    out_dtype = query.dtype
    a_dtype = attn_dtype if attn_dtype is not None else query.dtype

    TQ, Lp, nq = _pick_query_tile(L, max_q_tile)

    # ---- wrapper-side prep: head-major weights, pre-cast to matmul dtype ----
    wq_h = params["W_Q"].reshape(H, D, E).astype(mdt)
    wk_h = params["W_K"].reshape(H, D, E).astype(mdt)
    wv_h = params["W_V"].reshape(H, D, E).astype(mdt)
    bq_h = params["b_Q"].reshape(H, 1, D).astype(jnp.float32)
    bk_h = params["b_K"].reshape(H, 1, D).astype(jnp.float32)
    bv_h = params["b_V"].reshape(H, 1, D).astype(jnp.float32)
    wf = params["W_fc"].astype(mdt)                    # (E, E)  (out, in)
    bf = params["b_fc"].reshape(1, E).astype(jnp.float32)

    q_in = query if Lp == L else jnp.pad(query, ((0, 0), (0, Lp - L), (0, 0)))
    q_m = q_in.astype(mdt)
    k_m = key.astype(mdt)
    v_m = value.astype(mdt)

    # ---- VMEM budget (double-buffered inputs/outputs + scratch), cap 48 MiB ----
    itm = jnp.dtype(mdt).itemsize
    a_itm = jnp.dtype(a_dtype).itemsize
    est_a = (2 * TQ * E * itm            # q tile
             + 2 * 2 * L * E * itm       # K and V full-seq blocks
             + 2 * 3 * D * E * itm       # per-head weight blocks
             + 2 * 3 * D * 4             # per-head biases
             + 2 * TQ * D * itm          # ctx output tile
             + (2 * TQ * L * a_itm if with_attn else 0)
             + 2 * L * D * itm)          # Kh/Vh scratch
    vmem_a = int(min(max(2 * est_a, 16 * (1 << 20)), 48 * (1 << 20)))
    est_b = 2 * 2 * TQ * E * itm + 2 * E * E * itm + 2 * E * 4
    vmem_b = int(min(max(2 * est_b, 16 * (1 << 20)), 48 * (1 << 20)))

    # ---------------------------- Stage A ----------------------------------
    kernel_a = functools.partial(_attn_kernel, scale=scale_val,
                                 matmul_dtype=mdt, with_attn=with_attn)

    q_spec = pl.BlockSpec((1, TQ, E), lambda b, h, qi: (b, qi, 0))
    kv_spec = pl.BlockSpec((1, L, E), lambda b, h, qi: (b, 0, 0))
    w_spec = pl.BlockSpec((1, D, E), lambda b, h, qi: (h, 0, 0))
    bh_spec = pl.BlockSpec((1, 1, D), lambda b, h, qi: (h, 0, 0))
    ctx_spec = pl.BlockSpec((1, 1, TQ, D), lambda b, h, qi: (b, h, qi, 0))
    attn_spec = pl.BlockSpec((1, 1, TQ, L), lambda b, h, qi: (b, h, qi, 0))

    ctx_sds = jax.ShapeDtypeStruct((B, H, Lp, D), mdt)
    if with_attn:
        out_shape_a = (ctx_sds, jax.ShapeDtypeStruct((B, H, Lp, L), a_dtype))
        out_specs_a = (ctx_spec, attn_spec)
    else:
        out_shape_a = ctx_sds
        out_specs_a = ctx_spec

    results = pl.pallas_call(
        kernel_a,
        out_shape=out_shape_a,
        grid_spec=pltpu.PrefetchScalarGridSpec(
            num_scalar_prefetch=0,
            grid=(B, H, nq),
            in_specs=[q_spec, kv_spec, kv_spec,
                      w_spec, bh_spec, w_spec, bh_spec, w_spec, bh_spec],
            out_specs=out_specs_a,
            scratch_shapes=[pltpu.VMEM((L, D), mdt),    # Kh cache
                            pltpu.VMEM((L, D), mdt)],   # Vh cache
        ),
        compiler_params=pltpu.CompilerParams(
            dimension_semantics=("parallel", "parallel", "arbitrary"),
            vmem_limit_bytes=vmem_a,
        ),
    )(q_m, k_m, v_m, wq_h, bq_h, wk_h, bk_h, wv_h, bv_h)

    if with_attn:
        ctx, attn = results
    else:
        ctx, attn = results, None

    # Head combine: (B,H,Lp,D) -> (B,Lp,E) — the module's permute+view (wrapper glue).
    x_heads = ctx.transpose(0, 2, 1, 3).reshape(B, Lp, E)

    # ---------------------------- Stage B ----------------------------------
    out = pl.pallas_call(
        _out_proj_kernel,
        out_shape=jax.ShapeDtypeStruct((B, Lp, E), out_dtype),
        grid_spec=pltpu.PrefetchScalarGridSpec(
            num_scalar_prefetch=0,
            grid=(B, nq),
            in_specs=[pl.BlockSpec((1, TQ, E), lambda b, qi: (b, qi, 0)),
                      pl.BlockSpec((E, E), lambda b, qi: (0, 0)),
                      pl.BlockSpec((1, E), lambda b, qi: (0, 0))],
            out_specs=pl.BlockSpec((1, TQ, E), lambda b, qi: (b, qi, 0)),
        ),
        compiler_params=pltpu.CompilerParams(
            dimension_semantics=("parallel", "parallel"),
            vmem_limit_bytes=vmem_b,
        ),
    )(x_heads, wf, bf)

    # Strip query-axis padding.
    if Lp != L:
        out = out[:, :L]
        if attn is not None:
            attn = attn[:, :, :L, :]
    return out, attn


# ---------------------------------------------------------------------------
# Pure-JAX reference mirroring the PyTorch forward (eval-mode dropout).
# ---------------------------------------------------------------------------
def _reference(query, key, value, params, head_num, scale=None):
    B, L, E = query.shape
    D = E // head_num
    sc = float(scale) if scale is not None else math.sqrt(D)

    def lin(x, w, b):
        return jnp.einsum("ble,oe->blo", x, w, precision="highest") + b

    Q = lin(query, params["W_Q"], params["b_Q"]).reshape(B, L, head_num, D).transpose(0, 2, 1, 3)
    K = lin(key, params["W_K"], params["b_K"]).reshape(B, L, head_num, D).transpose(0, 2, 1, 3)
    V = lin(value, params["W_V"], params["b_V"]).reshape(B, L, head_num, D).transpose(0, 2, 1, 3)
    energy = jnp.einsum("bhld,bhmd->bhlm", Q, K, precision="highest") / sc
    attn = jax.nn.softmax(energy, axis=-1)
    x = jnp.einsum("bhlm,bhmd->bhld", attn, V, precision="highest")
    x = x.transpose(0, 2, 1, 3).reshape(B, L, E)
    x = lin(x, params["W_fc"], params["b_fc"])
    return x, attn


def _make_params(key0, E):
    ks = jax.random.split(key0, 8)

    def init_linear(kw, kb, fan_in, shape_w, shape_b):
        bound = 1.0 / math.sqrt(fan_in)
        w = jax.random.uniform(kw, shape_w, jnp.float32, -bound, bound)
        b = jax.random.uniform(kb, shape_b, jnp.float32, -bound, bound)
        return w, b

    W_Q, b_Q = init_linear(ks[0], ks[1], E, (E, E), (E,))
    W_K, b_K = init_linear(ks[2], ks[3], E, (E, E), (E,))
    W_V, b_V = init_linear(ks[4], ks[5], E, (E, E), (E,))
    W_fc, b_fc = init_linear(ks[6], ks[7], E, (E, E), (E,))
    return dict(W_Q=W_Q, b_Q=b_Q, W_K=W_K, b_K=b_K,
                W_V=W_V, b_V=b_V, W_fc=W_fc, b_fc=b_fc)


if __name__ == "__main__":
    # --- Small config consistent with the module: B=2, L=8, E=32, 4 heads ---
    B, L, E, H = 2, 8, 32, 4
    root = jax.random.PRNGKey(0)
    kp, kq, kk, kv, kp2, kq2, kk2, kv2 = jax.random.split(root, 8)

    params = _make_params(kp, E)
    query = jax.random.normal(kq, (B, L, E), jnp.float32)
    key = jax.random.normal(kk, (B, L, E), jnp.float32)
    value = jax.random.normal(kv, (B, L, E), jnp.float32)

    ref_out, ref_attn = _reference(query, key, value, params, H)

    # f32 MXU-input path (tighter check).
    out32, attn32 = multi_head_att(query, key, value, params, H,
                                   matmul_dtype=jnp.float32)
    out32 = jax.block_until_ready(out32)
    attn32 = jax.block_until_ready(attn32)
    assert out32.shape == (B, L, E) and attn32.shape == (B, H, L, L)
    assert jnp.allclose(out32, ref_out, atol=1e-2, rtol=1e-2)
    assert jnp.allclose(attn32, ref_attn, atol=1e-2, rtol=1e-2)

    # bf16 MXU-input path (performance default); bf16 attention-prob storage.
    outbf, attnbf = multi_head_att(query, key, value, params, H,
                                   matmul_dtype=jnp.bfloat16,
                                   attn_dtype=jnp.bfloat16)
    outbf = jax.block_until_ready(outbf)
    attnbf = jax.block_until_ready(attnbf)
    assert outbf.shape == (B, L, E) and attnbf.shape == (B, H, L, L)
    assert jnp.allclose(outbf, ref_out, atol=5e-2, rtol=5e-2)
    assert jnp.allclose(attnbf.astype(jnp.float32), ref_attn, atol=5e-2, rtol=5e-2)

    # Attention-probabilities output disabled (skips the dominant O(L^2) write).
    out_na, attn_na = multi_head_att(query, key, value, params, H,
                                     matmul_dtype=jnp.float32, with_attn=False)
    out_na = jax.block_until_ready(out_na)
    assert attn_na is None
    assert jnp.allclose(out_na, ref_out, atol=1e-2, rtol=1e-2)

    # --- Larger sequence exercising query tiling + padding + K/V scratch reuse ---
    B2, L2, E2, H2 = 1, 300, 32, 4
    params2 = _make_params(kp2, E2)
    q2 = jax.random.normal(kq2, (B2, L2, E2), jnp.float32)
    k2 = jax.random.normal(kk2, (B2, L2, E2), jnp.float32)
    v2 = jax.random.normal(kv2, (B2, L2, E2), jnp.float32)
    ref2_out, ref2_attn = _reference(q2, k2, v2, params2, H2)
    o2, a2 = multi_head_att(q2, k2, v2, params2, H2,
                            matmul_dtype=jnp.float32, max_q_tile=128)
    o2 = jax.block_until_ready(o2)
    a2 = jax.block_until_ready(a2)
    assert o2.shape == (B2, L2, E2) and a2.shape == (B2, H2, L2, L2)
    assert jnp.allclose(o2, ref2_out, atol=1e-2, rtol=1e-2)
    assert jnp.allclose(a2, ref2_attn, atol=1e-2, rtol=1e-2)

    print("KERNEL_OK")
</pallas_src>

<mosaic_0001>
module attributes {stable_mosaic.version = 11 : i64} {
  func.func @_attn_kernel(%arg0: i32, %arg1: i32, %arg2: i32, %arg3: memref<1x8x32xf32, #tpu.memory_space<vmem>>, %arg4: memref<1x8x32xf32, #tpu.memory_space<vmem>>, %arg5: memref<1x8x32xf32, #tpu.memory_space<vmem>>, %arg6: memref<1x8x32xf32, #tpu.memory_space<vmem>>, %arg7: memref<1x1x8xf32, #tpu.memory_space<vmem>>, %arg8: memref<1x8x32xf32, #tpu.memory_space<vmem>>, %arg9: memref<1x1x8xf32, #tpu.memory_space<vmem>>, %arg10: memref<1x8x32xf32, #tpu.memory_space<vmem>>, %arg11: memref<1x1x8xf32, #tpu.memory_space<vmem>>, %arg12: memref<1x1x8x8xf32, #tpu.memory_space<vmem>>, %arg13: memref<1x1x8x8xf32, #tpu.memory_space<vmem>>, %arg14: memref<8x8xf32, #tpu.memory_space<vmem>>, %arg15: memref<8x8xf32, #tpu.memory_space<vmem>>) attributes {dimension_semantics = [#tpu.dimension_semantics<parallel>, #tpu.dimension_semantics<parallel>, #tpu.dimension_semantics<arbitrary>], iteration_bounds = array<i64: 2, 4, 1>, scalar_prefetch = 0 : i64, scratch_operands = 2 : i64, tpu.core_type = #tpu.core_type<tc>, window_params = [{transform_indices = @transform_0, window_bounds = array<i64: 1, 8, 32>}, {transform_indices = @transform_1, window_bounds = array<i64: 1, 8, 32>}, {transform_indices = @transform_2, window_bounds = array<i64: 1, 8, 32>}, {transform_indices = @transform_3, window_bounds = array<i64: 1, 8, 32>}, {transform_indices = @transform_4, window_bounds = array<i64: 1, 1, 8>}, {transform_indices = @transform_5, window_bounds = array<i64: 1, 8, 32>}, {transform_indices = @transform_6, window_bounds = array<i64: 1, 1, 8>}, {transform_indices = @transform_7, window_bounds = array<i64: 1, 8, 32>}, {transform_indices = @transform_8, window_bounds = array<i64: 1, 1, 8>}, {transform_indices = @transform_9, window_bounds = array<i64: 1, 1, 8, 8>}, {transform_indices = @transform_10, window_bounds = array<i64: 1, 1, 8, 8>}]} {
    %c0_i32 = arith.constant 0 : i32
    %0 = arith.cmpi eq, %arg2, %c0_i32 : i32
    %1 = arith.extui %0 : i1 to i32
    %c0_i32_0 = arith.constant 0 : i32
    %2 = arith.cmpi ne, %1, %c0_i32_0 : i32
    scf.if %2 {
      %c0_27 = arith.constant 0 : index
      %c0_28 = arith.constant 0 : index
      %c0_29 = arith.constant 0 : index
      %35 = vector.load %arg4[%c0_27, %c0_28, %c0_29] : memref<1x8x32xf32, #tpu.memory_space<vmem>>, vector<1x8x32xf32>
      %36 = vector.shape_cast %35 : vector<1x8x32xf32> to vector<8x32xf32>
      %c0_30 = arith.constant 0 : index
      %c0_31 = arith.constant 0 : index
      %c0_32 = arith.constant 0 : index
      %37 = vector.load %arg8[%c0_30, %c0_31, %c0_32] : memref<1x8x32xf32, #tpu.memory_space<vmem>>, vector<1x8x32xf32>
      %38 = vector.shape_cast %37 : vector<1x8x32xf32> to vector<8x32xf32>
      %cst_33 = arith.constant dense<0.000000e+00> : vector<8x8xf32>
      %39 = tpu.matmul %36, %38, %cst_33 {dimension_numbers = #tpu.dot_dimension_numbers<[1], [1], [0], [0], [0, 0, 1, 0], [], []>} : vector<8x32xf32>, vector<8x32xf32>, vector<8x8xf32> -> vector<8x8xf32>
      %c0_34 = arith.constant 0 : index
      %c0_35 = arith.constant 0 : index
      %c0_36 = arith.constant 0 : index
      %40 = vector.load %arg9[%c0_34, %c0_35, %c0_36] : memref<1x1x8xf32, #tpu.memory_space<vmem>>, vector<1x1x8xf32>
      %41 = vector.shape_cast %40 : vector<1x1x8xf32> to vector<1x8xf32>
      %42 = vector.broadcast %41 : vector<1x8xf32> to vector<8x8xf32>
      %43 = arith.addf %39, %42 : vector<8x8xf32>
      %c0_37 = arith.constant 0 : index
      %c0_38 = arith.constant 0 : index
      %c0_39 = arith.constant 0 : index
      %44 = vector.load %arg5[%c0_37, %c0_38, %c0_39] : memref<1x8x32xf32, #tpu.memory_space<vmem>>, vector<1x8x32xf32>
      %45 = vector.shape_cast %44 : vector<1x8x32xf32> to vector<8x32xf32>
      %c0_40 = arith.constant 0 : index
      %c0_41 = arith.constant 0 : index
      %c0_42 = arith.constant 0 : index
      %46 = vector.load %arg10[%c0_40, %c0_41, %c0_42] : memref<1x8x32xf32, #tpu.memory_space<vmem>>, vector<1x8x32xf32>
      %47 = vector.shape_cast %46 : vector<1x8x32xf32> to vector<8x32xf32>
      %cst_43 = arith.constant dense<0.000000e+00> : vector<8x8xf32>
      %48 = tpu.matmul %45, %47, %cst_43 {dimension_numbers = #tpu.dot_dimension_numbers<[1], [1], [0], [0], [0, 0, 1, 0], [], []>} : vector<8x32xf32>, vector<8x32xf32>, vector<8x8xf32> -> vector<8x8xf32>
      %c0_44 = arith.constant 0 : index
      %c0_45 = arith.constant 0 : index
      %c0_46 = arith.constant 0 : index
      %49 = vector.load %arg11[%c0_44, %c0_45, %c0_46] : memref<1x1x8xf32, #tpu.memory_space<vmem>>, vector<1x1x8xf32>
      %50 = vector.shape_cast %49 : vector<1x1x8xf32> to vector<1x8xf32>
      %51 = vector.broadcast %50 : vector<1x8xf32> to vector<8x8xf32>
      %52 = arith.addf %48, %51 : vector<8x8xf32>
      %c0_47 = arith.constant 0 : index
      %c0_48 = arith.constant 0 : index
      %53 = vector.load %arg14[%c0_47, %c0_48] : memref<8x8xf32, #tpu.memory_space<vmem>>, vector<8x8xf32>
      tpu.vector_store %arg14[%c0_47, %c0_48], %43 {strides = array<i32>} : memref<8x8xf32, #tpu.memory_space<vmem>>, vector<8x8xf32>,
      %c0_49 = arith.constant 0 : index
      %c0_50 = arith.constant 0 : index
      %54 = vector.load %arg15[%c0_49, %c0_50] : memref<8x8xf32, #tpu.memory_space<vmem>>, vector<8x8xf32>
      tpu.vector_store %arg15[%c0_49, %c0_50], %52 {strides = array<i32>} : memref<8x8xf32, #tpu.memory_space<vmem>>, vector<8x8xf32>,
    } else {
    }
    %c0 = arith.constant 0 : index
    %c0_1 = arith.constant 0 : index
    %c0_2 = arith.constant 0 : index
    %3 = vector.load %arg3[%c0, %c0_1, %c0_2] : memref<1x8x32xf32, #tpu.memory_space<vmem>>, vector<1x8x32xf32>
    %4 = vector.shape_cast %3 : vector<1x8x32xf32> to vector<8x32xf32>
    %c0_3 = arith.constant 0 : index
    %c0_4 = arith.constant 0 : index
    %c0_5 = arith.constant 0 : index
    %5 = vector.load %arg6[%c0_3, %c0_4, %c0_5] : memref<1x8x32xf32, #tpu.memory_space<vmem>>, vector<1x8x32xf32>
    %6 = vector.shape_cast %5 : vector<1x8x32xf32> to vector<8x32xf32>
    %cst = arith.constant dense<0.000000e+00> : vector<8x8xf32>
    %7 = tpu.matmul %4, %6, %cst {dimension_numbers = #tpu.dot_dimension_numbers<[1], [1], [0], [0], [0, 0, 1, 0], [], []>} : vector<8x32xf32>, vector<8x32xf32>, vector<8x8xf32> -> vector<8x8xf32>
    %c0_6 = arith.constant 0 : index
    %c0_7 = arith.constant 0 : index
    %c0_8 = arith.constant 0 : index
    %8 = vector.load %arg7[%c0_6, %c0_7, %c0_8] : memref<1x1x8xf32, #tpu.memory_space<vmem>>, vector<1x1x8xf32>
    %9 = vector.shape_cast %8 : vector<1x1x8xf32> to vector<1x8xf32>
    %10 = vector.broadcast %9 : vector<1x8xf32> to vector<8x8xf32>
    %11 = arith.addf %7, %10 : vector<8x8xf32>
    %cst_9 = arith.constant 0.353553385 : f32
    %12 = vector.broadcast %cst_9 : f32 to vector<8x8xf32>
    %13 = arith.mulf %11, %12 : vector<8x8xf32>
    %c0_10 = arith.constant 0 : index
    %c0_11 = arith.constant 0 : index
    %14 = vector.load %arg14[%c0_10, %c0_11] : memref<8x8xf32, #tpu.memory_space<vmem>>, vector<8x8xf32>
    %cst_12 = arith.constant dense<0.000000e+00> : vector<8x8xf32>
    %15 = tpu.matmul %13, %14, %cst_12 {dimension_numbers = #tpu.dot_dimension_numbers<[1], [1], [0], [0], [0, 0, 1, 0], [], []>} : vector<8x8xf32>, vector<8x8xf32>, vector<8x8xf32> -> vector<8x8xf32>
    %cst_13 = arith.constant dense<0xFF800000> : vector<8xf32>
    %16 = vector.multi_reduction <maximumf>, %15, %cst_13 [1] : vector<8x8xf32> to vector<8xf32>
    %17 = vector.shape_cast %16 : vector<8xf32> to vector<8x1xf32>
    %18 = vector.broadcast %17 : vector<8x1xf32> to vector<8x8xf32>
    %19 = arith.subf %15, %18 : vector<8x8xf32>
    %20 = math.exp %19 : vector<8x8xf32>
    %cst_14 = arith.constant dense<0.000000e+00> : vector<8xf32>
    %21 = vector.multi_reduction <add>, %20, %cst_14 [1] : vector<8x8xf32> to vector<8xf32>
    %22 = vector.shape_cast %21 : vector<8xf32> to vector<8x1xf32>
    %cst_15 = arith.constant 1.000000e+00 : f32
    %23 = vector.broadcast %cst_15 : f32 to vector<8x1xf32>
    %24 = arith.divf %23, %22 : vector<8x1xf32>
    %25 = vector.broadcast %24 : vector<8x1xf32> to vector<8x8xf32>
    %26 = arith.mulf %20, %25 : vector<8x8xf32>
    %c0_16 = arith.constant 0 : index
    %c0_17 = arith.constant 0 : index
    %c0_18 = arith.constant 0 : index
    %c0_19 = arith.constant 0 : index
    %27 = vector.load %arg13[%c0_16, %c0_17, %c0_18, %c0_19] : memref<1x1x8x8xf32, #tpu.memory_space<vmem>>, vector<1x1x8x8xf32>
    %28 = vector.shape_cast %27 : vector<1x1x8x8xf32> to vector<8x8xf32>
    %29 = vector.shape_cast %26 : vector<8x8xf32> to vector<1x1x8x8xf32>
    tpu.vector_store %arg13[%c0_16, %c0_17, %c0_18, %c0_19], %29 {strides = array<i32>} : memref<1x1x8x8xf32, #tpu.memory_space<vmem>>, vector<1x1x8x8xf32>,
    %c0_20 = arith.constant 0 : index
    %c0_21 = arith.constant 0 : index
    %30 = vector.load %arg15[%c0_20, %c0_21] : memref<8x8xf32, #tpu.memory_space<vmem>>, vector<8x8xf32>
    %cst_22 = arith.constant dense<0.000000e+00> : vector<8x8xf32>
    %31 = tpu.matmul %26, %30, %cst_22 {dimension_numbers = #tpu.dot_dimension_numbers<[1], [0], [0], [1], [0, 0, 1, 1], [], []>} : vector<8x8xf32>, vector<8x8xf32>, vector<8x8xf32> -> vector<8x8xf32>
    %c0_23 = arith.constant 0 : index
    %c0_24 = arith.constant 0 : index
    %c0_25 = arith.constant 0 : index
    %c0_26 = arith.constant 0 : index
    %32 = vector.load %arg12[%c0_23, %c0_24, %c0_25, %c0_26] : memref<1x1x8x8xf32, #tpu.memory_space<vmem>>, vector<1x1x8x8xf32>
    %33 = vector.shape_cast %32 : vector<1x1x8x8xf32> to vector<8x8xf32>
    %34 = vector.shape_cast %31 : vector<8x8xf32> to vector<1x1x8x8xf32>
    tpu.vector_store %arg12[%c0_23, %c0_24, %c0_25, %c0_26], %34 {strides = array<i32>} : memref<1x1x8x8xf32, #tpu.memory_space<vmem>>, vector<1x1x8x8xf32>,
    return
  }
  func.func @transform_0(%arg0: i32, %arg1: i32, %arg2: i32) -> (i32, i32, i32) {
    %c0_i32 = arith.constant 0 : i32
    %c0_i32_0 = arith.constant 0 : i32
    return %arg0, %arg2, %c0_i32 : i32, i32, i32
  }
  func.func @transform_1(%arg0: i32, %arg1: i32, %arg2: i32) -> (i32, i32, i32) {
    %c0_i32 = arith.constant 0 : i32
    %c0_i32_0 = arith.constant 0 : i32
    %c0_i32_1 = arith.constant 0 : i32
    return %arg0, %c0_i32, %c0_i32_0 : i32, i32, i32
  }
  func.func @transform_2(%arg0: i32, %arg1: i32, %arg2: i32) -> (i32, i32, i32) {
    %c0_i32 = arith.constant 0 : i32
    %c0_i32_0 = arith.constant 0 : i32
    %c0_i32_1 = arith.constant 0 : i32
    return %arg0, %c0_i32, %c0_i32_0 : i32, i32, i32
  }
  func.func @transform_3(%arg0: i32, %arg1: i32, %arg2: i32) -> (i32, i32, i32) {
    %c0_i32 = arith.constant 0 : i32
    %c0_i32_0 = arith.constant 0 : i32
    %c0_i32_1 = arith.constant 0 : i32
    return %arg1, %c0_i32, %c0_i32_0 : i32, i32, i32
  }
  func.func @transform_4(%arg0: i32, %arg1: i32, %arg2: i32) -> (i32, i32, i32) {
    %c0_i32 = arith.constant 0 : i32
    %c0_i32_0 = arith.constant 0 : i32
    %c0_i32_1 = arith.constant 0 : i32
    return %arg1, %c0_i32, %c0_i32_0 : i32, i32, i32
  }
  func.func @transform_5(%arg0: i32, %arg1: i32, %arg2: i32) -> (i32, i32, i32) {
    %c0_i32 = arith.constant 0 : i32
    %c0_i32_0 = arith.constant 0 : i32
    %c0_i32_1 = arith.constant 0 : i32
    return %arg1, %c0_i32, %c0_i32_0 : i32, i32, i32
  }
  func.func @transform_6(%arg0: i32, %arg1: i32, %arg2: i32) -> (i32, i32, i32) {
    %c0_i32 = arith.constant 0 : i32
    %c0_i32_0 = arith.constant 0 : i32
    %c0_i32_1 = arith.constant 0 : i32
    return %arg1, %c0_i32, %c0_i32_0 : i32, i32, i32
  }
  func.func @transform_7(%arg0: i32, %arg1: i32, %arg2: i32) -> (i32, i32, i32) {
    %c0_i32 = arith.constant 0 : i32
    %c0_i32_0 = arith.constant 0 : i32
    %c0_i32_1 = arith.constant 0 : i32
    return %arg1, %c0_i32, %c0_i32_0 : i32, i32, i32
  }
  func.func @transform_8(%arg0: i32, %arg1: i32, %arg2: i32) -> (i32, i32, i32) {
    %c0_i32 = arith.constant 0 : i32
    %c0_i32_0 = arith.constant 0 : i32
    %c0_i32_1 = arith.constant 0 : i32
    return %arg1, %c0_i32, %c0_i32_0 : i32, i32, i32
  }
  func.func @transform_9(%arg0: i32, %arg1: i32, %arg2: i32) -> (i32, i32, i32, i32) {
    %c0_i32 = arith.constant 0 : i32
    %c0_i32_0 = arith.constant 0 : i32
    return %arg0, %arg1, %arg2, %c0_i32 : i32, i32, i32, i32
  }
  func.func @transform_10(%arg0: i32, %arg1: i32, %arg2: i32) -> (i32, i32, i32, i32) {
    %c0_i32 = arith.constant 0 : i32
    %c0_i32_0 = arith.constant 0 : i32
    return %arg0, %arg1, %arg2, %c0_i32 : i32, i32, i32, i32
  }
}

</mosaic_0001>

<bundles_post_ra>
// kernel: tpu_custom_call.1
= control target key start
LH: loop header
LB: loop body
LE: loop exit
PB: predicated region body
PF: predicated region fallthrough
CT: control target
= control target key end

     0   :  { %s2312_s0 = inlined_call_operand.hbm [shape: f32[2,8,32], index: 0, kind: input, shape index: {}]   ;;  %s2313_s1 = inlined_call_operand.hbm [shape: f32[2,8,32], index: 1, kind: input, shape index: {}]   ;;  %s2314_s2 = inlined_call_operand.hbm [shape: f32[2,8,32], index: 2, kind: input, shape index: {}]   ;;  %s2315_s3 = inlined_call_operand.hbm [shape: f32[4,8,32], index: 3, kind: input, shape index: {}]   ;;  %s2316_s4 = inlined_call_operand.hbm [shape: f32[4,1,8], index: 4, kind: input, shape index: {}]   ;;  %s2317_s5 = inlined_call_operand.hbm [shape: f32[4,8,32], index: 5, kind: input, shape index: {}]   ;;  %s2318_s6 = inlined_call_operand.vmem [shape: f32[4,1,8], index: 6, kind: input, shape index: {}]   ;;  %s2319_s7 = inlined_call_operand.hbm [shape: f32[4,8,32], index: 7, kind: input, shape index: {}]   ;;  %s2320_s8 = inlined_call_operand.hbm [shape: f32[4,1,8], index: 8, kind: input, shape index: {}]   ;;  %s2321_s9 = inlined_call_operand.hbm [shape: f32[2,4,8,8], index: 9, kind: output, shape index: {0}]   ;;  %s2322_s10 = inlined_call_operand.hbm [shape: f32[2,4,8,8], index: 10, kind: output, shape index: {1}]  }
   0x1   :  { %2348 = sst [smem:[#allocation43_spill]] %s2312_s0 }
   0x2   :  { %2349 = sst [smem:[#allocation44_spill]] %s2313_s1 }
   0x3   :  { %2350 = sst [smem:[#allocation45_spill]] %s2314_s2 }
   0x4   :  { %2351 = sst [smem:[#allocation46_spill]] %s2315_s3 }
   0x5   :  { %2352 = sst [smem:[#allocation47_spill]] %s2316_s4 }
   0x6   :  { %2353 = sst [smem:[#allocation48_spill]] %s2317_s5 }
   0x7   :  { %2354 = sst [smem:[#allocation49_spill]] %s2318_s6 }
   0x8   :  { %2355 = sst [smem:[#allocation50_spill]] %s2319_s7 }
   0x9   :  { %2356 = sst [smem:[#allocation51_spill]] %s2320_s8 }
   0xa   :  { %2357 = sst [smem:[#allocation52_spill]] %s2321_s9 }
   0xb   :  { %2358 = sst [smem:[#allocation53_spill]] %s2322_s10 }
   0xc   :  { %16 = vsyncpa [#allocation5], 0 }
   0xd   :  { %18 = vsyncpa [#allocation5 + $0x1], 0 }
   0xe   :  { %19 = vsyncpa [#allocation8], 0 }
   0xf   :  { %21 = vsyncpa [#allocation8 + $0x1], 0 }
  0x10   :  { %22 = vsyncpa [#allocation11], 0 }
  0x11   :  { %24 = vsyncpa [#allocation11 + $0x1], 0 }
  0x12   :  { %25 = vsyncpa [#allocation14], 0 }
  0x13   :  { %27 = vsyncpa [#allocation14 + $0x1], 0 }
  0x14   :  { %28 = vsyncpa [#allocation17], 0 }
  0x15   :  { %30 = vsyncpa [#allocation17 + $0x1], 0 }
  0x16   :  { %31 = vsyncpa [#allocation6], 0 }
  0x17   :  { %33 = vsyncpa [#allocation6 + $0x1], 0 }
  0x18   :  { %34 = vsyncpa [#allocation20], 0 }
  0x19   :  { %36 = vsyncpa [#allocation20 + $0x1], 0  ;;  %s1897_s13 = smov 0   ;;  %s1899_s14 = smov 0  }
  0x1a   :  { %s1901_s15 = smov 0   ;;  %s1903_s16 = smov 0  }
  0x1b   :  { %s1905_s17 = smov 0   ;;  %s1907_s18 = smov 0  }
  0x1c   :  { %s1909_s19 = smov 0   ;;  %s1911_s20 = smov 0  }
  0x1d   :  { %s1913_s21 = smov 0   ;;  %s1915_s22 = smov 0  }
  0x1e   :  { %s1917_s23 = smov 0   ;;  %s1919_s24 = smov 0  }
  0x1f   :  { %s1921_s25 = smov 0   ;;  %s1923_s26 = smov 0  }
  0x20 LB: > { %2359 = sst [smem:[#allocation28_spill]] %s1788_s13  ;;  %s1964_s27 = sadd.s32 4294967295, %s1840_s26   ;;  %s1840_s26 = sphi %s1923_s26, %s42_s26   ;;  %s1836_s25 = sphi %s1921_s25, %s2431_s25   ;;  %s1832_s24 = sphi %s1919_s24, %s2430_s24   ;;  %s1828_s23 = sphi %s1917_s23, %s2429_s23   ;;  %s1824_s22 = sphi %s1915_s22, %s2428_s22   ;;  %s1820_s21 = sphi %s1913_s21, %s2427_s21   ;;  %s1816_s20 = sphi %s1911_s20, %s2426_s20   ;;  %s1812_s19 = sphi %s1909_s19, %s2419_s19   ;;  %s1808_s18 = sphi %s1907_s18, %s2425_s18   ;;  %s1804_s17 = sphi %s1905_s17, %s2424_s17   ;;  %s1800_s16 = sphi %s1903_s16, %s2418_s16   ;;  %s1796_s15 = sphi %s1901_s15, %s2423_s15   ;;  %s1792_s14 = sphi %s1899_s14, %s2422_s14   ;;  %s1788_s13 = sphi %s1897_s13, %s2417_s13  }
  0x21   : > { %2360 = sst [smem:[#allocation29_spill]] %s1792_s14  ;;  %s1192_s28 = sadd.s32 4294967294, %s1840_s26  }
  0x22   : > { %2361 = sst [smem:[#allocation30_spill]] %s1804_s17  ;;  %p77_p0 = scmp.ne.s32.totalorder %s1820_s21, %s1816_s20 }
  0x23   : > { %2362 = sst [smem:[#allocation31_spill]] %s1816_s20  ;;  %p78_p1 = scmp.eq.s32.totalorder %s1840_s26, 0 }
  0x24   : > { %2363 = sst [smem:[#allocation32_spill]] %s1824_s22  ;;  %p83_p2 = scmp.ne.s32.totalorder %s1816_s20, %s1812_s19 }
  0x25   : > { %2364 = sst [smem:[#allocation33_spill]] %s1828_s23  ;;  %p84_p3 = scmp.eq.s32.totalorder %s1964_s27, 0 }
  0x26   : > { %2365 = sst [smem:[#allocation34_spill]] %s1840_s26  ;;  %p1974_p4 = por %p78_p1, %p77_p0 }
  0x27   : > { %2366 = sst [smem:[#allocation35_spill]] %s1964_s27  ;;  %p1979_p5 = por %p84_p3, %p83_p2 }
  0x28   : > { %p155_p6 = scmp.ne.s32.totalorder %s1808_s18, %s1804_s17  ;;  %p161_p7 = scmp.ne.s32.totalorder %s1804_s17, %s1800_s16 }
  0x29   : > { %s2368_s9 = scalar_select %p1979_p5, 1, 0 }
  0x2a   : > { %p318_p8 = scmp.ne.s32.totalorder %s1796_s15, %s1792_s14  ;;  %p1988_p9 = por %p155_p6, %p78_p1 }
  0x2b   : > { %2369 = sst [smem:[#allocation36_spill]] %s2368_s9  ;;  %p319_p10 = scmp.eq.s32.totalorder %s1964_s27, 7 }
  0x2c   : > { %p1993_p11 = por %p161_p7, %p84_p3  ;;  %p324_p12 = scmp.ne.s32.totalorder %s1792_s14, %s1788_s13 }
  0x2d   : > { %p1999_p13 = por %p319_p10, %p318_p8  ;;  %p325_p0 = scmp.eq.s32.totalorder %s1192_s28, 7 }
  0x2e   : > { %s2371_s30 = scalar_select %p1993_p11, 1, 0 }
  0x2f   : > { %s2373_s12 = scalar_select %p1999_p13, 1, 0 }
  0x30   : > { %2372 = sst [smem:[#allocation37_spill]] %s2371_s30  ;;  %p1285_p2 = scmp.lt.s32.totalorder %s1840_s26, 8 }
  0x31   : > { %2374 = sst [smem:[#allocation38_spill]] %s2373_s12  ;;  %p2004_p5 = por %p325_p0, %p324_p12 }
  0x32   : > { %s2330_s29 = sand.u32 1, %s1820_s21   ;;  %s2014_s13 = sshll.u32 %s1836_s25, 3 }
  0x33   : > { %s2375_s16 = scalar_select %p2004_p5, 1, 0 }
  0x34   : > { %s2011_s10 = sshll.u32 %s2330_s29, 3  ;;  %p2020_p1 = pnand %p1285_p2, %p1974_p4 }
  0x35   : > { %2376 = sst [smem:[#allocation39_spill]] %s2375_s16  ;;  %s2025_s12 = sand.u32 1, %s1840_s26  }
  0x36   : > { %s2378_s1 = sld [smem:[#allocation44_spill]]  ;;  %s399_s11 = scalar_lea.vmem [#allocation7], %s2011_s10 }
  0x37   : > { %s407_s6 = sshll.u32 %s399_s11, 4  ;;  %s2333_s22 = scalar_lea.sflag [#allocation8], %s2025_s12  ;;  %s408_s6 = int_to_ptr.vmem [resolvable:$true] %s407_s6 }
  0x38   : > { %p2041_p3 = pnand %p1285_p2, %p1988_p9  ;;  %p1207_p4 = scmp.ge.s32.totalorder %s1840_s26, 1 }
  0x39   : > { %p528_p6 = scmp.lt.s32.totalorder %s1840_s26, 9  ;;  %s57_s16 = sadd.s32 1, %s1832_s24 }
  0x3a   : > { %p59_p8 = scmp.ge.s32.totalorder %s57_s16, 4  ;;  %s308_s11 = sadd.s32 1, %s1796_s15 }
  0x3b   : > { %p2047_p7 = pnand %p1207_p4, %p528_p6  ;;  %s2385_s26 = sadd.s32 1, %s1808_s18 }
  0x3c   : > { %s403_s29 = scalar_lea.hbm %s2378_s1, %s2014_s13  ;;  %s2054_s1 = sand.u32 1, %s1808_s18  }
  0x3d   : > { %s405_s14 = sshll.u32 %s403_s29, 4  ;;  %s2433_s16 = smov (%p59_p8, %s57_s16), 0  ;;  %s406_s14 = int_to_ptr.hbm [resolvable:$true] %s405_s14 }
  0x3e   : > { %1259 = dma.hbm_to_vmem [thread:$0]  (!%p2020_p1), %s406_s14, 128, %s408_s6, %s2333_s22  }
  0x3f   : > { %s2380_s29 = scalar_select %p2047_p7, 1, 0 }
  0x40   : > { %2382 = sst [smem:[#allocation41_spill]] %s2433_s16  ;;  %s2383_s6 = sadd.s32 1, %s1836_s25 }
  0x41   : > { %2381 = sst [smem:[#allocation40_spill]] %s2380_s29  ;;  %s2435_s6 = smov (!%p59_p8, %s2383_s6), %s1836_s25 }
  0x42   : > { %s145_s14 = ssub.s32 %s1832_s24, %s2433_s16  ;;  %s2064_s19 = sshll.u32 %s2054_s1, 3 }
  0x43   : > { %p63_p9 = scmp.ge.s32.totalorder %s2435_s6, 2  ;;  %p146_p10 = scmp.eq.s32.totalorder %s145_s14, 0 }
  0x44   : > { %s2067_s22 = sshll.u32 %s1832_s24, 3  ;;  %s2386_s3 = sld [smem:[#allocation46_spill]] }
  0x45   : > { %s2437_s6 = smov (%p63_p9, %s2435_s6), 0  ;;  %s2387_s8 = sadd.s32 1, %s1820_s21 }
  0x46   : > { %2384 = sst [smem:[#allocation42_spill]] %s2437_s6  ;;  %s65_s17 = ssub.s32 %s1836_s25, %s2437_s6 }
  0x47   : > { %s2074_s30 = scalar_select %p146_p10, %s1808_s18, %s2385_s26  }
  0x48   : > { %p68_p12 = scmp.eq.s32.totalorder %s65_s17, 0  ;;  %s303_s20 = sor.u32 %s145_s14, %s65_s17 }
  0x49   : > { %p306_p0 = scmp.eq.s32.totalorder %s303_s20, 0  ;;  %s437_s26 = scalar_lea.vmem [#allocation10], %s2064_s19 }
  0x4a   : > { %s441_s9 = scalar_lea.hbm %s2386_s3, %s2067_s22  ;;  %s445_s6 = sshll.u32 %s437_s26, 4  ;;  %s446_s6 = int_to_ptr.vmem [resolvable:$true] %s445_s6 }
  0x4b   : > { %s443_s29 = sshll.u32 %s441_s9, 4  ;;  %s2346_s27 = scalar_lea.sflag [#allocation11], %s2025_s12  ;;  %s444_s29 = int_to_ptr.hbm [resolvable:$true] %s443_s29 }
  0x4c   : > { %s2085_s7 = scalar_select %p68_p12, %s1820_s21, %s2387_s8  }
  0x4d   : > { %s2088_s4 = scalar_select %p306_p0, %s1796_s15, %s308_s11  }
  0x4e   : > { %1265 = dma.hbm_to_vmem [thread:$0]  (!%p2041_p3), %s444_s29, 128, %s446_s6, %s2346_s27  }
  0x4f   : > { %s2388_s5 = sld [smem:[#allocation48_spill]]  ;;  %s473_s16 = scalar_lea.vmem [#allocation13], %s2064_s19 }
  0x50   : > { %s481_s11 = sshll.u32 %s473_s16, 4  ;;  %s2347_s14 = scalar_lea.sflag [#allocation14], %s2025_s12  ;;  %s482_s11 = int_to_ptr.vmem [resolvable:$true] %s481_s11 }
  0x51   : > { %s2389_s0 = sld [smem:[#allocation43_spill]]  ;;  %s379_s17 = scalar_lea.vmem [#allocation4], %s2011_s10 }
  0x52   : > { %s388_s9 = sshll.u32 %s379_s17, 4  ;;  %s2390_s16 = sand.u32 1, %s1820_s21   ;;  %s389_s9 = int_to_ptr.vmem [resolvable:$true] %s388_s9 }
  0x53   : > { %s376_s27 = scalar_lea.sflag [#allocation5], %s2390_s16  ;;  %s2391_s2 = sld [smem:[#allocation45_spill]] }
  0x54   : > { %s418_s26 = scalar_lea.vmem [#allocation9], %s2011_s10  ;;  %s2394_s10 = scalar_lea.sflag [#allocation11], %s2025_s12 }
  0x55   : > { %s477_s20 = scalar_lea.hbm %s2388_s5, %s2067_s22  ;;  %s426_s29 = sshll.u32 %s418_s26, 4  ;;  %s427_s29 = int_to_ptr.vmem [resolvable:$true] %s426_s29 }
  0x56   : > { %s479_s8 = sshll.u32 %s477_s20, 4  ;;  %s2397_s16 = sld [smem:[#allocation51_spill]]  ;;  %s480_s8 = int_to_ptr.hbm [resolvable:$true] %s479_s8 }
  0x57   : > { %1271 = dma.hbm_to_vmem [thread:$0]  (!%p2041_p3), %s480_s8, 128, %s482_s11, %s2347_s14  }
  0x58   : > { %s384_s6 = scalar_lea.hbm %s2389_s0, %s2014_s13  ;;  %s2393_s0 = sld [smem:[#allocation47_spill]] }
  0x59   : > { %s386_s20 = sshll.u32 %s384_s6, 4  ;;  %s422_s11 = scalar_lea.hbm %s2391_s2, %s2014_s13  ;;  %s387_s20 = int_to_ptr.hbm [resolvable:$true] %s386_s20 }
  0x5a   : > { %1256 = dma.hbm_to_vmem [thread:$0]  (!%p2020_p1), %s387_s20, 128, %s389_s9, %s376_s27  }
  0x5b   : > { %s424_s14 = sshll.u32 %s422_s11, 4  ;;  %s2392_s6 = scalar_lea.sflag [#allocation8], %s2025_s12  ;;  %s425_s14 = int_to_ptr.hbm [resolvable:$true] %s424_s14 }
  0x5c   : > { %1262 = dma.hbm_to_vmem [thread:$0]  (!%p2020_p1), %s425_s14, 128, %s427_s29, %s2392_s6  }
  0x5d   : > { %s455_s9 = scalar_lea.vmem [#allocation12], %s2054_s1  ;;  %s2395_s8 = sld [smem:[#allocation50_spill]] }
  0x5e   : > { %s458_s27 = scalar_lea.hbm %s2393_s0, %s1832_s24  ;;  %s462_s3 = sshll.u32 %s455_s9, 4  ;;  %s463_s3 = int_to_ptr.vmem [resolvable:$true] %s462_s3 }
  0x5f   : > { %s460_s20 = sshll.u32 %s458_s27, 4  ;;  %s498_s14 = scalar_lea.vmem [#allocation15], %s2064_s19  ;;  %s461_s20 = int_to_ptr.hbm [resolvable:$true] %s460_s20 }
  0x60   : > { %1268 = dma.hbm_to_vmem [thread:$0]  (!%p2041_p3), %s461_s20, 16, %s463_s3, %s2394_s10  }
  0x61   : > { %s506_s26 = sshll.u32 %s498_s14, 4  ;;  %s2396_s0 = scalar_lea.sflag [#allocation14], %s2025_s12  ;;  %s507_s26 = int_to_ptr.vmem [resolvable:$true] %s506_s26 }
  0x62   : > { %s519_s27 = scalar_lea.hbm %s2397_s16, %s1832_s24  ;;  %s516_s2 = scalar_lea.vmem [#allocation16], %s2054_s1 }
  0x63   : > { %s502_s11 = scalar_lea.hbm %s2395_s8, %s2067_s22  ;;  %s521_s9 = sshll.u32 %s519_s27, 4  ;;  %s522_s9 = int_to_ptr.hbm [resolvable:$true] %s521_s9 }
  0x64   : > { %s504_s29 = sshll.u32 %s502_s11, 4  ;;  %s523_s5 = sshll.u32 %s516_s2, 4  ;;  %s505_s29 = int_to_ptr.hbm [resolvable:$true] %s504_s29  ;;  %s524_s5 = int_to_ptr.vmem [resolvable:$true] %s523_s5 }
  0x65   : > { %1274 = dma.hbm_to_vmem [thread:$0]  (!%p2041_p3), %s505_s29, 128, %s507_s26, %s2396_s0  }
  0x66   : > { %s514_s3 = scalar_lea.sflag [#allocation17], %s2054_s1  ;;  %532 = sbr.rel (%p2047_p7) target bundleno = 808 (0x328), region = 56 }
  0x67   : > { %1277 = dma.hbm_to_vmem [thread:$0]  (!%p2041_p3), %s522_s9, 16, %s524_s5, %s514_s3  }
  0x68   : > { %s2399_s19 = sld [smem:[#allocation31_spill]] (!%p2047_p7) }
  0x69   : > { %s2400_s20 = sld [smem:[#allocation36_spill]] (!%p2047_p7) }
  0x6e   : > { %s534_s10 = sand.u32 1, %s2399_s19  }
  0x6f   : > { %s2153_s12 = sshll.u32 %s534_s10, 3  ;;  %s535_s13 = scalar_lea.sflag [#allocation5], %s534_s10 }
  0x70   : > { %s538_s28 = scalar_lea.vmem [#allocation4], %s2153_s12  ;;  %p2401_p2 = scmp.ne.s32.totalorder %s2400_s20, 0 }
  0x72   : > { %1759 = dma.done.wait (%p2401_p2), %s535_s13, 128  }
  0x73   : > { %1761 = vsyncadd (%p2401_p2), %s535_s13, 4294967168  ;;  %s2402_s2 = sld [smem:[#allocation35_spill]]  ;;  %s548_s23 = scalar_lea.vmem [#allocation7], %s2153_s12 }
  0x79   : > { %s544_s1 = sand.u32 1, %s2402_s2  }
  0x7a   : > { %s545_s5 = scalar_lea.sflag [#allocation8], %s544_s1 }
  0x7b   : > { %1763 = dma.done.wait (%p2401_p2), %s545_s5, 256  }
  0x7c   : > { %1765 = vsyncadd (%p2401_p2), %s545_s5, 4294967040  ;;  %s2403_s8 = sld [smem:[#allocation30_spill]]  ;;  %s558_s29 = scalar_lea.vmem [#allocation9], %s2153_s12 }
  0x7d   : > { %s565_s0 = scalar_lea.sflag [#allocation11], %s544_s1 }
  0x82   : > { %s2167_s14 = sand.u32 1, %s2403_s8  }
  0x83   : > { %s2170_s26 = sshll.u32 %s2167_s14, 3 }
  0x84   : > { %s568_s6 = scalar_lea.vmem [#allocation10], %s2170_s26 }
  0x85   : > { %1767 = dma.done.wait (%p1993_p11), %s565_s0, 144  }
  0x86   : > { %1769 = vsyncadd (%p1993_p11), %s565_s0, 4294967152  ;;  %s577_s17 = scalar_lea.vmem [#allocation12], %s2167_s14  ;;  %s584_s16 = scalar_lea.sflag [#allocation14], %s544_s1 }
  0x87   : > { %s587_s27 = scalar_lea.vmem [#allocation13], %s2170_s26 }
  0x88   : > { %1771 = dma.done.wait (%p1993_p11), %s584_s16, 256  }
  0x89   : > { %1773 = vsyncadd (%p1993_p11), %s584_s16, 4294967040  ;;  %s597_s9 = scalar_lea.vmem [#allocation15], %s2170_s26  ;;  %s604_s3 = scalar_lea.sflag [#allocation17], %s2167_s14 }
  0x8a   : > { %s606_s22 = scalar_lea.vmem [#allocation16], %s2167_s14 }
  0x8b   : > { %1775 = dma.done.wait (%p1993_p11), %s604_s3, 16  }
  0x8c   : > { %1777 = vsyncadd (%p1993_p11), %s604_s3, 4294967280  ;;  %s2405_s19 = sld [smem:[#allocation32_spill]]  ;;  %vm698_vm0 = vcmask 261120   ;;  %v693_v0 = vld [vmem:[%s587_s27] sm:$0xff]  ;;  %v761_v1 = vld [vmem:[%s568_s6] sm:$0xff]  ;;  %vm757_vm1 = vcmask 64512  }
  0x8d   : > { %s2406_s2 = sld [smem:[#allocation49_spill]]  ;;  %1216 = vmatpush.xpose.msk.msra.mxu0 %vm698_vm0, %v693_v0  ;;  %v692_v2 = vld [vmem:[%s548_s23] sm:$0xff]  ;;  %1220 = vmatpush.xpose.msk.msra.mxu2 %vm698_vm0, %v761_v1  ;;  %v760_v3 = vld [vmem:[%s538_s28] sm:$0xff] }
  0x8e   : > { %v1400_v7 = vld [vmem:[%s577_s17] ss:$0 sm:$0xff]  ;;  %v726_v14 = vld [vmem:[%s597_s9] sm:$0xff]  ;;  %v725_v15 = vld [vmem:[%s558_s29] sm:$0xff]  ;;  %s2407_s28 = sld [smem:[#allocation29_spill]] }
  0x8f   : > { %1218 = vmatpush.xpose.msk.msra.mxu1 %vm698_vm0, %v726_v14  ;;  %v1401_v21 = vld [vmem:[%s606_s22] ss:$0 sm:$0xff]  ;;  %s2408_s5 = sld [smem:[#allocation33_spill]] }
  0x90   : > { %1217 = vmatmul.msk.f32.vlgmr.msra.gmra.mxu0 %vm698_vm0, %v692_v2  ;;  %1221 = vmatmul.msk.f32.vlgmr.msra.gmra.mxu2 %vm698_vm0, %v760_v3  ;;  %s2410_s6 = sld [smem:[#allocation53_spill]] }
  0x92   : > { %p685_p1 = scmp.lt.s32.totalorder %s2405_s19, 3  ;;  %1219 = vmatmul.msk.f32.vlgmr.msra.gmra.mxu1 %vm698_vm0, %v725_v15 }
  0x94   : > { %s686_s20 = scalar_select %p685_p1, %s2405_s19, 3 }
  0x95   : > { %s2217_s12 = sand.u32 1, %s2407_s28   ;;  %s1227_s23 = sshll.u32 %s2408_s5, 2 }
  0x96   : > { %s687_s1 = scalar_lea.vmem %s2406_s2, %s686_s20  ;;  %s1214_s8 = sshll.u32 %s2217_s12, 3 }
  0x97   : > { %v1399_v4 = vld [vmem:[%s687_s1] ss:$0 sm:$0xff]  ;;  %s2222_s11 = sadd.s32 %s2405_s19, %s1227_s23  ;;  %s684_s16 = scalar_lea.vmem [#allocation19], %s1214_s8 }
  0x98   : > { %s1228_s14 = sshll.u32 %s2222_s11, 3  ;;  %s911_s27 = sshll.u32 %s684_s16, 4  ;;  %s912_s27 = int_to_ptr.vmem [resolvable:$true] %s911_s27 }
  0x99   : > { %s909_s17 = scalar_lea.hbm %s2410_s6, %s1228_s14  ;;  %s879_s3 = scalar_lea.sflag [#allocation20], %s2217_s12 }
  0x9a   : > { %s913_s9 = sshll.u32 %s909_s17, 4  ;;  %s1666_s13 = scalar_lea.hbm %s2410_s6, 64  ;;  %s914_s9 = int_to_ptr.hbm [resolvable:$true] %s913_s9 }
  0x9b   : > { %s1660_s22 = sshra.s32 %s914_s9, 4  ;;  %s1661_s22 = int_to_ptr.hbm [resolvable:$true] %s1660_s22 }
  0x9c   : > { %s1662_s19 = scalar_lea.hbm %s1661_s22, 8  ;;  %p1667_p6 = scmp.lt.s32.totalorder %s1661_s22, %s2410_s6 }
  0x9d   : > { %p1663_p11 = scmp.ne.s32.totalorder %s1661_s22, %s1662_s19  ;;  %p1668_p7 = scmp.lt.s32.totalorder %s1666_s13, %s1662_s19 }
  0x9f   : > { %p1664_p3 = pnand %p1663_p11, %p1999_p13  ;;  %p1669_p8 = por %p1668_p7, %p1667_p6 }
  0xa1   : > { %p1665_p4 = pneg %p1664_p3 }
  0xa3   : > { %p1670_p9 = pnand %p1669_p8, %p1665_p4 }
 0x10d   : > { %v722_v5 = vpop.f32.mrf.mxu0 }
 0x10e   : > { %v723_v6 = vadd.f32 %v1399_v4, %v722_v5 }
 0x10f   : > { %v754_v22 = vpop.f32.mrf.mxu1 }
 0x110   : > { %758 = vst.msk [vmem:[#allocation2] sm:$0xff] %vm757_vm1, %v723_v6  ;;  %v755_v23 = vadd.f32 %v1401_v21, %v754_v22 }
 0x112   : > { %759 = vst.msk [vmem:[#allocation3] sm:$0xff] %vm757_vm1, %v755_v23 }
 0x113   : > { %v790_v8 = vpop.f32.mrf.mxu2 }
 0x114   : > { %v791_v9 = vadd.f32 %v1400_v7, %v790_v8 }
 0x116   : > { %v793_v10 = vmul.f32 0.35355338, %v791_v9 }
 0x117   : > { %v794_v11 = vld [vmem:[#allocation2] sm:$0xff] }
 0x118   : > { %1222 = vmatpush.xpose.msk.msra.mxu3 %vm757_vm1, %v794_v11 }
 0x119   : > { %v848_v24 = vld [vmem:[#allocation3] sm:$0xff] }
 0x11a   : > { %867 = vmatpush.msrb.mxu0 %v848_v24 }
 0x11b   : > { %1223 = vmatmul.msk.f32.vlgmr.msra.gmra.mxu3 %vm757_vm1, %v793_v10 }
 0x19e   : > { %v819_v12 = vpop.f32.mrf.mxu3 }
 0x19f   : > { %v822_v13 = vsel %vm757_vm1, %v819_v12, -inf }
 0x1a0   : > { %823 = vmax.xlane.f32.xlu0 %v822_v13 }
 0x213   : > { %v824_v16 = vpop.xlane.xlu0 %823 }
 0x214   : > { %v825_v17 = vsub.f32 %v819_v12, %v824_v16 }
 0x216   : > { %v826_v18 = vmul.f32 1.442695, %v825_v17 }
 0x218   : > { %1402 = vpow2.f32 %v826_v18 }
 0x21e   : > { %v1403_v19 = vpop.eup %1402 }
 0x21f   : > { %v828_v20 = vsel %vm757_vm1, %v1403_v19, 0.0 }
 0x220   : > { %829 = vadd.xlane.f32.xlu0 %v828_v20 }
 0x293   : > { %v830_v25 = vpop.xlane.xlu0 %829 }
 0x294   : > { %1404 = vrcp.f32 %v830_v25  ;;  %v842_v29 = vand.u32 2147483648, %v830_v25  ;;  %v840_v31 = vand.u32 2147483647, %v830_v25  ;;  %vm836_vm3 = vweird.f32 %v830_v25 }
 0x296   : > { %v843_v33 = vor.u32 1.1754944e-38, %v842_v29  ;;  %vm841_vm5 = vcmp.eq.f32.partialorder %v840_v31, 8.507059e+37 }
 0x29a   : > { %v1405_v26 = vpop.eup %1404 }
 0x29b   : > { %v832_v27 = vmul.f32 %v1405_v26, %v830_v25  ;;  %vm837_vm2 = vweird.f32 %v1405_v26 }
 0x29c   : > { %vm838_vm4 = vmor %vm836_vm3, %vm837_vm2 }
 0x29d   : > { %v833_v28 = vsub.f32 1.0, %v832_v27 }
 0x29f   : > { %v834_v30 = vmul.f32 %v1405_v26, %v833_v28 }
 0x2a1   : > { %v835_v32 = vadd.f32 %v1405_v26, %v834_v30 }
 0x2a3   : > { %v839_v34 = vsel %vm838_vm4, %v1405_v26, %v835_v32 }
 0x2a4   : > { %v844_v35 = vsel %vm841_vm5, %v843_v33, %v839_v34 }
 0x2a5   : > { %v846_v36 = vmul.f32 %v1403_v19, %v844_v35 }
 0x2a7   : > { %1224 = vmatmul.msk.f32.vlgmr.msrb.gmra.mxu0 %vm757_vm1, %v846_v36  ;;  %847 = vst.msk [vmem:[%s684_s16] sm:$0xff] %vm757_vm1, %v846_v36 }
 0x2a8   : > { %1673 = shalt.err (!%p1670_p9)
}
 0x2a9   : > { %1250 = dma.vmem_to_hbm [thread:$0]  (%p1999_p13), %s912_s27, 128, %s914_s9, %s879_s3  }
 0x2aa   : > { %s2411_s23 = sld [smem:[#allocation52_spill]]  ;;  %s677_s0 = scalar_lea.vmem [#allocation18], %s1214_s8 }
 0x2ab   : > { %s894_s17 = sshll.u32 %s677_s0, 4  ;;  %s874_s22 = scalar_lea.sflag [#allocation6], %s2217_s12  ;;  %s895_s17 = int_to_ptr.vmem [resolvable:$true] %s894_s17 }
 0x2b0   : > { %s2412_s11 = smov %s2411_s23  ;;  %s892_s29 = scalar_lea.hbm %s2411_s23, %s1228_s14 }
 0x2b1   : > { %s896_s16 = sshll.u32 %s892_s29, 4  ;;  %s1694_s14 = scalar_lea.hbm %s2412_s11, 64  ;;  %s897_s16 = int_to_ptr.hbm [resolvable:$true] %s896_s16 }
 0x2b2   : > { %s1688_s19 = sshra.s32 %s897_s16, 4  ;;  %s1689_s19 = int_to_ptr.hbm [resolvable:$true] %s1688_s19 }
 0x2b3   : > { %s1690_s20 = scalar_lea.hbm %s1689_s19, 8  ;;  %p1695_p2 = scmp.lt.s32.totalorder %s1689_s19, %s2412_s11 }
 0x2b4   : > { %p1691_p10 = scmp.ne.s32.totalorder %s1689_s19, %s1690_s20  ;;  %p1696_p1 = scmp.lt.s32.totalorder %s1694_s14, %s1690_s20 }
 0x2b6   : > { %p1692_p12 = pnand %p1691_p10, %p1999_p13  ;;  %p1697_p11 = por %p1696_p1, %p1695_p2 }
 0x2b8   : > { %p1693_p0 = pneg %p1692_p12 }
 0x2ba   : > { %p1698_p3 = pnand %p1697_p11, %p1693_p0 }
 0x324   : > { %v869_v37 = vpop.f32.mrf.mxu0 }
 0x325   : > { %872 = vst.msk [vmem:[%s677_s0] sm:$0xff] %vm757_vm1, %v869_v37 }
 0x326   : > { %1701 = shalt.err (!%p1698_p3)
}
 0x327   : > { %1249 = dma.vmem_to_hbm [thread:$0]  (%p1999_p13), %s895_s17, 128, %s897_s16, %s874_s22  }
 0x328 PF: > { %s2413_s12 = sld [smem:[#allocation34_spill]] }
 0x329   : > { %s2414_s10 = sld [smem:[#allocation28_spill]] }
 0x32e   : > { %p1286_p4 = scmp.ge.s32.totalorder %s2413_s12, 2 }
 0x32f   : > { %s925_s2 = sand.u32 1, %s2414_s10  }
 0x330   : > { %p1279_p6 = pnand %p1286_p4, %p2004_p5  ;;  %s926_s1 = scalar_lea.sflag [#allocation6], %s925_s2 }
 0x332   : > { %p1280_p7 = pneg %p1279_p6 }
 0x334   : > { %1779 = dma.done.wait (%p1280_p7), %s926_s1, 128  }
 0x335   : > { %1781 = vsyncadd (%p1280_p7), %s926_s1, 4294967168  ;;  %s936_s28 = scalar_lea.sflag [#allocation20], %s925_s2 }
 0x336   : > { %1783 = dma.done.wait (%p1280_p7), %s936_s28, 128  }
 0x337   : > { %1785 = vsyncadd (%p1280_p7), %s936_s28, 4294967168  ;;  %s42_s26 = sadd.s32 1, %s2413_s12   ;;  %s2417_s13 = sld [smem:[#allocation29_spill]] }
 0x338   : > { %p2265_p8 = scmp.ge.s32.totalorder %s42_s26, 10   ;;  %s2418_s16 = sld [smem:[#allocation30_spill]] }
 0x339   : > { %s2419_s19 = sld [smem:[#allocation31_spill]]  ;;  %s2422_s14 = smov %s1796_s15 }
 0x33a   : > { %s2420_s29 = sld [smem:[#allocation41_spill]]  ;;  %s2423_s15 = smov %s2088_s4 }
 0x33b   : > { %s2421_s0 = sld [smem:[#allocation42_spill]]  ;;  %s2424_s17 = smov %s1808_s18 }
 0x33c   : > { %s2425_s18 = smov %s2074_s30  ;;  %s2426_s20 = smov %s1820_s21 }
 0x33d   : > { %s2427_s21 = smov %s2085_s7  ;;  %s2428_s22 = smov %s1832_s24 }
 0x33e   : > { %s2429_s23 = smov %s1836_s25  ;;  %41 = sbr.rel (!%p2265_p8) target bundleno = 32 (0x20), region = 210 }
 0x340   : > { %s2430_s24 = smov %s2420_s29 }
 0x341   : > { %s2431_s25 = smov %s2421_s0 }
 0x343   :  { %942 = vsyncpa [#allocation5], 1 }
 0x344   :  { %944 = vsyncpa [#allocation5 + $0x1], 1 }
 0x345   :  { %945 = vsyncpa [#allocation8], 1 }
 0x346   :  { %947 = vsyncpa [#allocation8 + $0x1], 1 }
 0x347   :  { %948 = vsyncpa [#allocation11], 1 }
 0x348   :  { %950 = vsyncpa [#allocation11 + $0x1], 1 }
 0x349   :  { %951 = vsyncpa [#allocation14], 1 }
 0x34a   :  { %953 = vsyncpa [#allocation14 + $0x1], 1 }
 0x34b   :  { %954 = vsyncpa [#allocation17], 1 }
 0x34c   :  { %956 = vsyncpa [#allocation17 + $0x1], 1 }
 0x34d   :  { %957 = vsyncpa [#allocation6], 1 }
 0x34e   :  { %959 = vsyncpa [#allocation6 + $0x1], 1 }
 0x34f   :  { %960 = vsyncpa [#allocation20], 1 }
 0x350   :  { %962 = vsyncpa [#allocation20 + $0x1], 1 }

</bundles_post_ra>
